<compile_context>
chip_gen: v7x
topology: tpu7x:2x2x1
jax: 0.10.0
libtpu: 0.0.40
codegen_flags: <defaults>
</compile_context>

<pallas_src>
import jax
import jax.numpy as jnp
from jax.experimental import pallas as pl
from jax.experimental.pallas import tpu as pltpu

_LANE = 128
_CHUNK = 2048            # in-kernel lane-chunk size for the compute loop
_MAX_BLOCK_B = 16384     # cap on the batch tile
_VMEM_BUDGET = 8 * 1024 * 1024   # conservative; fits all scoped-VMEM defaults


def _round_up(n, m):
    return ((n + m - 1) // m) * m


def _choose_block_b(B, D):
    """Batch-tile size from a VMEM budget (double-buffered f32 in + out)."""
    per_row = 2 * D * 4 + 2 * 4
    bt = max(_VMEM_BUDGET // per_row, _LANE)
    bt = min(bt, _MAX_BLOCK_B)
    if bt >= _CHUNK:
        bt = (bt // _CHUNK) * _CHUNK
    else:
        bt = (bt // _LANE) * _LANE
    return max(bt, _LANE)


def _make_kernel(chunk, n_chunks, compute_dtype):
    def kernel(x_ref, w1t_ref, b1_ref, w2t_ref, b2_ref, w3c_ref, b3_ref, o_ref):
        w1t = w1t_ref[...]           # (H1, D)   compute_dtype
        w2t = w2t_ref[...]           # (H2, H1)  compute_dtype
        b1 = b1_ref[...]             # (H1, 1)   f32
        b2 = b2_ref[...]             # (H2, 1)   f32
        w3c = w3c_ref[...]           # (H2, 1)   f32
        b3 = b3_ref[...]             # (1, 1)    f32

        def one_chunk(r):
            xb = x_ref[pl.ds(r, chunk), :].astype(compute_dtype)          # (chunk, D)
            # Layer 1: contract on the shared D axis (NT form) so the batch
            # stays on the lane axis of the result; x^T is never materialized.
            h = jax.lax.dot_general(w1t, xb, (((1,), (1,)), ((), ())),
                                    preferred_element_type=jnp.float32)   # (H1, chunk)
            h = jnp.maximum(h + b1, 0.0).astype(compute_dtype)
            h = jnp.dot(w2t, h, preferred_element_type=jnp.float32)       # (H2, chunk)
            h = jnp.maximum(h + b2, 0.0)
            # Layer 3 (out_features = 1): VPU multiply + sublane reduction
            # instead of an M=1 matmul that would re-stream h through the MXU.
            out = jnp.sum(h * w3c, axis=0, keepdims=True) + b3            # (1, chunk)
            o_ref[:, pl.ds(r, chunk)] = out.astype(o_ref.dtype)

        if n_chunks == 1:
            one_chunk(0)
        else:
            def body(c, carry):
                one_chunk(pl.multiple_of(c * chunk, chunk))
                return carry
            jax.lax.fori_loop(0, n_chunks, body, 0, unroll=True)

    return kernel


def mlp_purity_forward(x, params, *, block_b=None, use_bf16=True):
    """x: (B, input_dim) f32.  params: w1,b1,w2,b2,w3,b3 stored (in,out)/(1,out)."""
    w1, b1, w2, b2, w3, b3 = (params[k] for k in ("w1", "b1", "w2", "b2", "w3", "b3"))
    B, D = x.shape
    H1, H2 = w1.shape[1], w2.shape[1]
    compute_dtype = jnp.bfloat16 if use_bf16 else jnp.float32

    # ---- batch tile ----------------------------------------------------------
    if block_b is None:
        block_b = _choose_block_b(B, D)
    if B <= block_b and B <= 4 * _LANE:
        bt = B                                   # one full-extent block
    elif B <= block_b:
        # Big batch that fits one cap: still split into >= 4 lane-aligned tiles
        # so a multi-TensorCore part (v7x) can spread them across cores.
        bt = min(block_b, _round_up(pl.cdiv(B, 4), _LANE))
        bt = max(_LANE, (bt // _LANE) * _LANE)
    else:
        bt = max(_LANE, (block_b // _LANE) * _LANE)
    bt = min(bt, B)
    grid_b = pl.cdiv(B, bt)

    # In-kernel chunking of one tile keeps the (32, chunk) f32 intermediates small.
    if bt > _CHUNK and bt % _CHUNK == 0:
        chunk, n_chunks = _CHUNK, bt // _CHUNK
    else:
        chunk, n_chunks = bt, 1

    # ---- operands ------------------------------------------------------------
    # Weights transposed once (tiny) and cast to the MXU dtype; biases and the
    # (H2, 1) output weight column stay f32 (they are VPU-side only).
    w1t = w1.T.astype(compute_dtype)             # (H1, D)
    w2t = w2.T.astype(compute_dtype)             # (H2, H1)
    b1c = b1.T.astype(jnp.float32)               # (H1, 1)
    b2c = b2.T.astype(jnp.float32)               # (H2, 1)
    w3c = w3.astype(jnp.float32)                 # (H2, 1)
    b3c = b3.astype(jnp.float32)                 # (1, 1)

    def resident(arr):
        # Constant block index -> fetched once, VMEM-resident across grid steps.
        return pl.BlockSpec(arr.shape, lambda i: (0, 0))

    flops = 2 * B * (D * H1 + H1 * H2 + H2)
    bytes_accessed = int(
        x.size * x.dtype.itemsize + B * 4
        + w1t.size * w1t.dtype.itemsize + w2t.size * w2t.dtype.itemsize
        + (H1 + H2 + H2 + 1) * 4
    )

    out = pl.pallas_call(
        _make_kernel(chunk, n_chunks, compute_dtype),
        out_shape=jax.ShapeDtypeStruct((1, B), jnp.float32),
        grid=(grid_b,),
        in_specs=[
            pl.BlockSpec((bt, D), lambda i: (i, 0)),   # batch tile (double-buffered)
            resident(w1t), resident(b1c),
            resident(w2t), resident(b2c),
            resident(w3c), resident(b3c),
        ],
        out_specs=pl.BlockSpec((1, bt), lambda i: (0, i)),   # lane-dense output row
        compiler_params=pltpu.CompilerParams(
            dimension_semantics=("parallel",),
        ),
        cost_estimate=pl.CostEstimate(
            flops=flops, transcendentals=0, bytes_accessed=bytes_accessed
        ),
    )(x, w1t, b1c, w2t, b2c, w3c, b3c)

    # (1, B) -> (B, 1) torch layout (same contiguous data, no slice copy).
    return out.reshape(B, 1)


def init_params(key, input_dim, hidden_dims=(32, 32)):
    """Deterministic init mimicking torch.nn.Linear default:
    U(-1/sqrt(fan_in), 1/sqrt(fan_in)) for both weight and bias."""
    params = {}
    dims = [input_dim] + list(hidden_dims) + [1]
    for i, name in enumerate(["1", "2", "3"]):
        fan_in, fan_out = dims[i], dims[i + 1]
        key, kw, kb = jax.random.split(key, 3)
        bound = 1.0 / jnp.sqrt(float(fan_in))
        # stored as (in, out) so the math is x @ W (== torch x @ W_torch.T)
        params["w" + name] = jax.random.uniform(
            kw, (fan_in, fan_out), jnp.float32, -bound, bound)
        params["b" + name] = jax.random.uniform(
            kb, (1, fan_out), jnp.float32, -bound, bound)
    return params


def mlp_purity_ref(x, params):
    """Pure-JAX f32 reference for correctness checking."""
    h = jnp.maximum(x @ params["w1"] + params["b1"], 0.0)
    h = jnp.maximum(h @ params["w2"] + params["b2"], 0.0)
    return h @ params["w3"] + params["b3"]


if __name__ == "__main__":
    key = jax.random.PRNGKey(0)
    key, kx = jax.random.split(key)

    B, INPUT_DIM = 8, 16
    x = jax.random.normal(kx, (B, INPUT_DIM), jnp.float32)
    params = init_params(key, INPUT_DIM, hidden_dims=(32, 32))
    ref = mlp_purity_ref(x, params)

    # 1) f32-operand path: exact algorithm check.
    out_f32 = jax.block_until_ready(mlp_purity_forward(x, params, use_bf16=False))
    assert out_f32.shape == (B, 1), out_f32.shape
    assert jnp.allclose(out_f32, ref, atol=1e-5, rtol=1e-5), (out_f32, ref)

    # 2) default bf16-operand / f32-accumulation path: looser tolerance.
    out_bf16 = jax.block_until_ready(mlp_purity_forward(x, params))
    assert out_bf16.shape == (B, 1), out_bf16.shape
    assert jnp.allclose(out_bf16, ref, atol=3e-2, rtol=3e-2), (out_bf16, ref)

    # 3) multi-tile grid with a ragged tail (B not a multiple of the tile).
    B2 = 260
    key, kx2 = jax.random.split(key)
    x2 = jax.random.normal(kx2, (B2, INPUT_DIM), jnp.float32)
    out2 = jax.block_until_ready(
        mlp_purity_forward(x2, params, block_b=128, use_bf16=False))
    ref2 = mlp_purity_ref(x2, params)
    assert out2.shape == (B2, 1), out2.shape
    assert jnp.allclose(out2, ref2, atol=1e-5, rtol=1e-5), (out2, ref2)

    # 4) chunked inner loop (tile > 2048) + ragged tail + 2 grid steps.
    B3 = 4100
    key, kx3 = jax.random.split(key)
    x3 = jax.random.normal(kx3, (B3, INPUT_DIM), jnp.float32)
    out3 = jax.block_until_ready(
        mlp_purity_forward(x3, params, block_b=4096, use_bf16=False))
    ref3 = mlp_purity_ref(x3, params)
    assert out3.shape == (B3, 1), out3.shape
    assert jnp.allclose(out3, ref3, atol=1e-5, rtol=1e-5), (out3, ref3)

    print("KERNEL_OK")
</pallas_src>

<mosaic_0001>
module attributes {stable_mosaic.version = 11 : i64} {
  func.func @kernel(%arg0: i32, %arg1: memref<8x16xf32, #tpu.memory_space<vmem>>, %arg2: memref<32x16xf32, #tpu.memory_space<vmem>>, %arg3: memref<32x1xf32, #tpu.memory_space<vmem>>, %arg4: memref<32x32xf32, #tpu.memory_space<vmem>>, %arg5: memref<32x1xf32, #tpu.memory_space<vmem>>, %arg6: memref<32x1xf32, #tpu.memory_space<vmem>>, %arg7: memref<1x1xf32, #tpu.memory_space<vmem>>, %arg8: memref<1x8xf32, #tpu.memory_space<vmem>>) attributes {dimension_semantics = [#tpu.dimension_semantics<parallel>], iteration_bounds = array<i64: 1>, scalar_prefetch = 0 : i64, scratch_operands = 0 : i64, tpu.core_type = #tpu.core_type<tc>, window_params = [{transform_indices = @transform_0, window_bounds = array<i64: 8, 16>}, {pipeline_mode = #tpu.pipeline_mode<synchronous>, transform_indices = @transform_1, window_bounds = array<i64: 32, 16>}, {pipeline_mode = #tpu.pipeline_mode<synchronous>, transform_indices = @transform_2, window_bounds = array<i64: 32, 1>}, {pipeline_mode = #tpu.pipeline_mode<synchronous>, transform_indices = @transform_3, window_bounds = array<i64: 32, 32>}, {pipeline_mode = #tpu.pipeline_mode<synchronous>, transform_indices = @transform_4, window_bounds = array<i64: 32, 1>}, {pipeline_mode = #tpu.pipeline_mode<synchronous>, transform_indices = @transform_5, window_bounds = array<i64: 32, 1>}, {pipeline_mode = #tpu.pipeline_mode<synchronous>, transform_indices = @transform_6, window_bounds = array<i64: 1, 1>}, {transform_indices = @transform_7, window_bounds = array<i64: 1, 8>}]} {
    %c0 = arith.constant 0 : index
    %c0_0 = arith.constant 0 : index
    %0 = vector.load %arg2[%c0, %c0_0] : memref<32x16xf32, #tpu.memory_space<vmem>>, vector<32x16xf32>
    %c0_1 = arith.constant 0 : index
    %c0_2 = arith.constant 0 : index
    %1 = vector.load %arg4[%c0_1, %c0_2] : memref<32x32xf32, #tpu.memory_space<vmem>>, vector<32x32xf32>
    %c0_3 = arith.constant 0 : index
    %c0_4 = arith.constant 0 : index
    %2 = vector.load %arg3[%c0_3, %c0_4] : memref<32x1xf32, #tpu.memory_space<vmem>>, vector<32x1xf32>
    %c0_5 = arith.constant 0 : index
    %c0_6 = arith.constant 0 : index
    %3 = vector.load %arg5[%c0_5, %c0_6] : memref<32x1xf32, #tpu.memory_space<vmem>>, vector<32x1xf32>
    %c0_7 = arith.constant 0 : index
    %c0_8 = arith.constant 0 : index
    %4 = vector.load %arg6[%c0_7, %c0_8] : memref<32x1xf32, #tpu.memory_space<vmem>>, vector<32x1xf32>
    %c0_9 = arith.constant 0 : index
    %c0_10 = arith.constant 0 : index
    %5 = vector.load %arg7[%c0_9, %c0_10] : memref<1x1xf32, #tpu.memory_space<vmem>>, vector<1x1xf32>
    %c0_11 = arith.constant 0 : index
    %c0_12 = arith.constant 0 : index
    %6 = vector.load %arg1[%c0_11, %c0_12] : memref<8x16xf32, #tpu.memory_space<vmem>>, vector<8x16xf32>
    %cst = arith.constant dense<0.000000e+00> : vector<32x8xf32>
    %7 = tpu.matmul %0, %6, %cst {dimension_numbers = #tpu.dot_dimension_numbers<[1], [1], [0], [0], [0, 0, 1, 0], [], []>} : vector<32x16xf32>, vector<8x16xf32>, vector<32x8xf32> -> vector<32x8xf32>
    %8 = vector.broadcast %2 : vector<32x1xf32> to vector<32x8xf32>
    %9 = arith.addf %7, %8 : vector<32x8xf32>
    %cst_13 = arith.constant 0.000000e+00 : f32
    %10 = vector.broadcast %cst_13 : f32 to vector<32x8xf32>
    %11 = arith.maximumf %9, %10 : vector<32x8xf32>
    %cst_14 = arith.constant dense<0.000000e+00> : vector<32x8xf32>
    %12 = tpu.matmul %1, %11, %cst_14 {dimension_numbers = #tpu.dot_dimension_numbers<[1], [0], [0], [1], [0, 0, 1, 1], [], []>} : vector<32x32xf32>, vector<32x8xf32>, vector<32x8xf32> -> vector<32x8xf32>
    %13 = vector.broadcast %3 : vector<32x1xf32> to vector<32x8xf32>
    %14 = arith.addf %12, %13 : vector<32x8xf32>
    %cst_15 = arith.constant 0.000000e+00 : f32
    %15 = vector.broadcast %cst_15 : f32 to vector<32x8xf32>
    %16 = arith.maximumf %14, %15 : vector<32x8xf32>
    %17 = vector.broadcast %4 : vector<32x1xf32> to vector<32x8xf32>
    %18 = arith.mulf %16, %17 : vector<32x8xf32>
    %cst_16 = arith.constant dense<0.000000e+00> : vector<8xf32>
    %19 = vector.multi_reduction <add>, %18, %cst_16 [0] : vector<32x8xf32> to vector<8xf32>
    %20 = vector.shape_cast %19 : vector<8xf32> to vector<1x8xf32>
    %21 = vector.broadcast %5 : vector<1x1xf32> to vector<1x8xf32>
    %22 = arith.addf %20, %21 : vector<1x8xf32>
    %c0_17 = arith.constant 0 : index
    %c0_18 = arith.constant 0 : index
    %23 = vector.load %arg8[%c0_17, %c0_18] : memref<1x8xf32, #tpu.memory_space<vmem>>, vector<1x8xf32>
    tpu.vector_store %arg8[%c0_17, %c0_18], %22 {strides = array<i32>} : memref<1x8xf32, #tpu.memory_space<vmem>>, vector<1x8xf32>,
    return
  }
  func.func @transform_0(%arg0: i32) -> (i32, i32) {
    %c0_i32 = arith.constant 0 : i32
    %c0_i32_0 = arith.constant 0 : i32
    return %arg0, %c0_i32 : i32, i32
  }
  func.func @transform_1(%arg0: i32) -> (i32, i32) {
    %c0_i32 = arith.constant 0 : i32
    %c0_i32_0 = arith.constant 0 : i32
    %c0_i32_1 = arith.constant 0 : i32
    return %c0_i32, %c0_i32_0 : i32, i32
  }
  func.func @transform_2(%arg0: i32) -> (i32, i32) {
    %c0_i32 = arith.constant 0 : i32
    %c0_i32_0 = arith.constant 0 : i32
    %c0_i32_1 = arith.constant 0 : i32
    return %c0_i32, %c0_i32_0 : i32, i32
  }
  func.func @transform_3(%arg0: i32) -> (i32, i32) {
    %c0_i32 = arith.constant 0 : i32
    %c0_i32_0 = arith.constant 0 : i32
    %c0_i32_1 = arith.constant 0 : i32
    return %c0_i32, %c0_i32_0 : i32, i32
  }
  func.func @transform_4(%arg0: i32) -> (i32, i32) {
    %c0_i32 = arith.constant 0 : i32
    %c0_i32_0 = arith.constant 0 : i32
    %c0_i32_1 = arith.constant 0 : i32
    return %c0_i32, %c0_i32_0 : i32, i32
  }
  func.func @transform_5(%arg0: i32) -> (i32, i32) {
    %c0_i32 = arith.constant 0 : i32
    %c0_i32_0 = arith.constant 0 : i32
    %c0_i32_1 = arith.constant 0 : i32
    return %c0_i32, %c0_i32_0 : i32, i32
  }
  func.func @transform_6(%arg0: i32) -> (i32, i32) {
    %c0_i32 = arith.constant 0 : i32
    %c0_i32_0 = arith.constant 0 : i32
    %c0_i32_1 = arith.constant 0 : i32
    return %c0_i32, %c0_i32_0 : i32, i32
  }
  func.func @transform_7(%arg0: i32) -> (i32, i32) {
    %c0_i32 = arith.constant 0 : i32
    %c0_i32_0 = arith.constant 0 : i32
    return %c0_i32, %arg0 : i32, i32
  }
}

</mosaic_0001>

<bundles_post_ra>
// kernel: tpu_custom_call.1
= control target key start
LH: loop header
LB: loop body
LE: loop exit
PB: predicated region body
PF: predicated region fallthrough
CT: control target
= control target key end

     0   :  { %s576_s0 = inlined_call_operand.vmem [shape: f32[8,16], index: 0, kind: input, shape index: {}]   ;;  %s577_s1 = inlined_call_operand.vmem [shape: f32[32,16], index: 1, kind: input, shape index: {}]   ;;  %s578_s2 = inlined_call_operand.vmem [shape: f32[32,1], index: 2, kind: input, shape index: {}]   ;;  %s579_s3 = inlined_call_operand.vmem [shape: f32[32,32], index: 3, kind: input, shape index: {}]   ;;  %s580_s4 = inlined_call_operand.vmem [shape: f32[32,1], index: 4, kind: input, shape index: {}]   ;;  %s581_s5 = inlined_call_operand.vmem [shape: f32[32,1], index: 5, kind: input, shape index: {}]   ;;  %s582_s6 = inlined_call_operand.<no memory space> [shape: f32[1,1], index: 6, kind: input, shape index: {}]   ;;  %s583_s7 = inlined_call_operand.hbm [shape: f32[1,8], index: 7, kind: output, shape index: {}]  }
   0x1   :  { %v12_v0 = vstv %s582_s6 }
   0x2   :  { %13 = vst [vmem:[#allocation2] sm:$0x1] %v12_v0 }
   0x3   :  { %v50_v1 = vld [vmem:[%s576_s0] sm:$0xff]  ;;  %vm71_vm0 = vcmask 130048   ;;  %v30_v4 = vld [vmem:[%s577_s1 + $0x8] sm:$0xff]  ;;  %v442_v5 = vmov 0   ;;  %v39_v6 = vld [vmem:[%s578_s2 + $0x10] sm:$0xff] }
   0x4   :  { %v29_v2 = vld [vmem:[%s577_s1] sm:$0xff]  ;;  %384 = vmatprep.subr.msk.mxu0 %vm71_vm0, %v50_v1  ;;  %416 = vset.pattern.permute.xlu0 %v442_v5  ;;  %v31_v7 = vld [vmem:[%s577_s1 + $0x10] sm:$0xff]  ;;  %v38_v8 = vld [vmem:[%s578_s2 + $0x8] sm:$0xff] }
   0x5   :  { %386 = vmatprep.mubr.msk.f32.mxu0 %vm71_vm0, %v29_v2  ;;  %v37_v3 = vld [vmem:[%s578_s2] sm:$0xff]  ;;  %385 = vmatpush3.xpose.msk.msra.mxu0 %vm71_vm0, %v50_v1  ;;  %v40_v9 = vld [vmem:[%s578_s2 + $0x18] sm:$0xff] }
   0x6   :  { %53 = vperm.xlu0 %416, %v37_v3   ;;  %417 = vset.pattern.permute.xlu1 %v442_v5  ;;  %v32_v10 = vld [vmem:[%s577_s1 + $0x18] sm:$0xff] }
   0x7   :  { %63 = vperm.xlu1 %417, %v39_v6  }
   0x8   :  { %387 = vmatmul.mubr.msk.f32.vlgmr.msra.gmra.mrb[0].mxu0 %vm71_vm0, %v30_v4 }
   0x9   :  { %389 = vmatprep.mubr.msk.f32.mxu0 %vm71_vm0, %v31_v7 }
   0xa   :  { %14 = vsyncpa [#allocation4], 0  ;;  %58 = vperm.xlu0 %416, %v38_v8   ;;  %v41_v11 = vld [vmem:[%s580_s4] sm:$0xff]  ;;  %v42_v12 = vld [vmem:[%s580_s4 + $0x8] sm:$0xff]  ;;  %vm196_vm1 = vcmask 261120   ;;  %vm322_vm2 = vcmask 64512   ;;  %v341_v8 = vlaneseq }
   0xb   :  { %68 = vperm.xlu1 %417, %v40_v9   ;;  %v43_v13 = vld [vmem:[%s580_s4 + $0x10] sm:$0xff]  ;;  %v44_v14 = vld [vmem:[%s580_s4 + $0x18] sm:$0xff]  ;;  %v45_v15 = vld [vmem:[%s581_s5] sm:$0xff]  ;;  %vm346_vm3 = vcmask 57344  }
   0xc   :  { %390 = vmatmul.mubr.msk.f32.gmra.mrb[2].mxu0 %vm71_vm0, %v32_v10  ;;  %v46_v16 = vld [vmem:[%s581_s5 + $0x8] sm:$0xff]  ;;  %v47_v17 = vld [vmem:[%s581_s5 + $0x10] sm:$0xff]  ;;  %v48_v18 = vld [vmem:[%s581_s5 + $0x18] sm:$0xff] }
   0xd   :  { %v49_v19 = vld [vmem:[#allocation2] sm:$0x1]  ;;  %v34_v39 = vld [vmem:[%s579_s3 + $0x8] sm:$0xff]  ;;  %v35_v40 = vld [vmem:[%s579_s3 + $0x10] sm:$0xff] }
   0xe   :  { %178 = vperm.xlu0 %416, %v41_v11   ;;  %v33_v20 = vld [vmem:[%s579_s3] sm:$0xff]  ;;  %v36_v41 = vld [vmem:[%s579_s3 + $0x18] sm:$0xff]  ;;  %v342_v11 = vshrl.u32 %v341_v8, 7  ;;  %s443_s3 = smov [#allocation3]  }
   0xf   :  { %183 = vperm.xlu1 %417, %v42_v12   ;;  %400 = vmatprep.mubr.msk.f32.mxu1 %vm196_vm1, %v33_v20  ;;  %s354_s14 = sshll.u32 %s443_s3, 4  ;;  %s355_s14 = int_to_ptr.vmem [resolvable:$true] %s354_s14 }
  0x10   :  { %s418_s15 = scalar_lea.vmem %s355_s14, 16  ;;  %s422_s16 = scalar_lea.vmem %s355_s14, 32 }
  0x11   :  { %p419_p0 = scmp.ne.s32.totalorder %s355_s14, %s418_s15  ;;  %p423_p1 = scmp.lt.s32.totalorder %s355_s14, %s355_s14 }
  0x12   :  { %188 = vperm.xlu0 %416, %v43_v13   ;;  %p424_p2 = scmp.lt.s32.totalorder %s422_s16, %s418_s15 }
  0x13   :  { %193 = vperm.xlu1 %417, %v44_v14   ;;  %v343_v14 = vsub.s32 0, %v342_v11 }
  0x14   :  { %p425_p3 = por %p424_p2, %p423_p1 }
  0x16   :  { %300 = vperm.xlu0 %416, %v45_v15   ;;  %p426_p4 = pnand %p425_p3, %p419_p0 }
  0x17   :  { %305 = vperm.xlu1 %417, %v46_v16  }
  0x1a   :  { %310 = vperm.xlu0 %416, %v47_v17  }
  0x1b   :  { %315 = vperm.xlu1 %417, %v48_v18  }
  0x1e   :  { %338 = vperm.xlu0 %416, %v49_v19  }
  0x85   :  { %v54_v21 = vpop.permute.xlu0 %53 }
  0x86   :  { %v64_v22 = vpop.permute.xlu1 %63 }
  0x89   :  { %v59_v23 = vpop.permute.xlu0 %58 }
  0x8a   :  { %v69_v29 = vpop.permute.xlu1 %68 }
  0x8d   :  { %v179_v42 = vpop.permute.xlu0 %178 }
  0x8e   :  { %v184_v43 = vpop.permute.xlu1 %183 }
  0x91   :  { %v189_v44 = vpop.permute.xlu0 %188 }
  0x92   :  { %v194_v45 = vpop.permute.xlu1 %193 }
  0x95   :  { %v301_v50 = vpop.permute.xlu0 %300 }
  0x96   :  { %v306_v51 = vpop.permute.xlu1 %305 }
  0x99   :  { %v311_v0 = vpop.permute.xlu0 %310 }
  0x9a   :  { %v316_v1 = vpop.permute.xlu1 %315 }
  0x9d   :  { %v339_v16 = vpop.permute.xlu0 %338 }
  0x9e   :  { %v344_v18 = vrot.slane %v339_v16, %v343_v14 }
  0xdb   :  { %v388_v24 = vpop.f32.mrb[0].mxu0 }
  0xdc   :  { %v159_v25 = vadd.f32 %v388_v24, %v59_v23  ;;  %v153_v26 = vpop.f32.mrb[1].mxu0 }
  0xdd   :  { %v154_v27 = vadd.f32 %v153_v26, %v54_v21 }
  0xde   :  { %v173_v28 = vmax.f32 %v159_v25, 0.0 }
  0xdf   :  { %v172_v30 = vmax.f32 %v154_v27, 0.0  ;;  %v391_v31 = vpop.f32.mrb[2].mxu0 }
  0xe0   :  { %v169_v32 = vadd.f32 %v391_v31, %v69_v29  ;;  %v163_v33 = vpop.f32.mrb[3].mxu0 }
  0xe1   :  { %v164_v34 = vadd.f32 %v163_v33, %v64_v22  ;;  %v406_v35 = vpack.c.bf16 %v173_v28, %v172_v30 }
  0xe2   :  { %v175_v36 = vmax.f32 %v169_v32, 0.0 }
  0xe3   :  { %v174_v37 = vmax.f32 %v164_v34, 0.0  ;;  %407 = vmatprep.subr.bf16.mxu1 %v406_v35 }
  0xe4   :  { %409 = vmatpush3.bf16.msra.mxu1 %v406_v35 }
  0xe5   :  { %v410_v38 = vpack.c.bf16 %v175_v36, %v174_v37 }
  0xe7   :  { %411 = vmatprep.subr.bf16.mxu1 %v410_v38 }
  0xe8   :  { %413 = vmatpush3.bf16.msra.mxu1 %v410_v38 }
  0xeb   :  { %401 = vmatmul.mubr.msk.f32.vlgmr.msra.gmra.mrb[0].mxu1 %vm196_vm1, %v34_v39 }
  0xec   :  { %403 = vmatprep.mubr.msk.f32.mxu1 %vm196_vm1, %v35_v40 }
  0xef   :  { %404 = vmatmul.mubr.msk.f32.gmra.mrb[2].mxu1 %vm196_vm1, %v36_v41 }
 0x1be   :  { %v402_v46 = vpop.f32.mrb[0].mxu1 }
 0x1bf   :  { %v281_v47 = vadd.f32 %v402_v46, %v184_v43  ;;  %v275_v48 = vpop.f32.mrb[1].mxu1 }
 0x1c0   :  { %v276_v49 = vadd.f32 %v275_v48, %v179_v42 }
 0x1c1   :  { %v295_v52 = vmax.f32 %v281_v47, 0.0 }
 0x1c2   :  { %v294_v53 = vmax.f32 %v276_v49, 0.0  ;;  %v405_v54 = vpop.f32.mrb[2].mxu1 }
 0x1c3   :  { %v319_v55 = vmul.f32 %v306_v51, %v295_v52  ;;  %v291_v56 = vadd.f32 %v405_v54, %v194_v45  ;;  %v285_v57 = vpop.f32.mrb[3].mxu1 }
 0x1c4   :  { %v318_v58 = vmul.f32 %v301_v50, %v294_v53  ;;  %v286_v59 = vadd.f32 %v285_v57, %v189_v44 }
 0x1c5   :  { %v324_v60 = vsel %vm322_vm2, %v319_v55, 0.0  ;;  %v297_v61 = vmax.f32 %v291_v56, 0.0 }
 0x1c6   :  { %v323_v62 = vsel %vm322_vm2, %v318_v58, 0.0  ;;  %v296_v63 = vmax.f32 %v286_v59, 0.0 }
 0x1c7   :  { %v325_v2 = vadd.f32 %v324_v60, %v323_v62  ;;  %v321_v3 = vmul.f32 %v316_v1, %v297_v61 }
 0x1c8   :  { %v320_v4 = vmul.f32 %v311_v0, %v296_v63 }
 0x1c9   :  { %v328_v7 = vsel %vm322_vm2, %v321_v3, 0.0 }
 0x1ca   :  { %v326_v5 = vsel %vm322_vm2, %v320_v4, 0.0 }
 0x1cb   :  { %v327_v6 = vadd.f32 %v326_v5, %v325_v2 }
 0x1cd   :  { %v329_v9 = vadd.f32 %v328_v7, %v327_v6 }
 0x1cf   :  { %v330_v10 = vrot.slane %v329_v9, 4 }
 0x1d1   :  { %v331_v12 = vadd.f32 %v330_v10, %v329_v9 }
 0x1d3   :  { %v332_v13 = vrot.slane %v331_v12, 2 }
 0x1d5   :  { %v333_v15 = vadd.f32 %v332_v13, %v331_v12 }
 0x1d7   :  { %v334_v17 = vrot.slane %v333_v15, 1 }
 0x1d9   :  { %v335_v19 = vadd.f32 %v334_v17, %v333_v15 }
 0x1db   :  { %v345_v20 = vadd.f32 %v344_v18, %v335_v19 }
 0x1dd   :  { %347 = vst.msk [vmem:[#allocation3] sm:$0x1] %vm346_vm3, %v345_v20 }
 0x1de   :  { %429 = shalt.err (!%p426_p4)
}
 0x1df   :  { %s430_s19 = scalar_lea.hbm %s583_s7, 16 }
 0x1e0   :  { %p431_p5 = scmp.ne.s32.totalorder %s583_s7, %s430_s19  ;;  %p434_p6 = scmp.lt.u32.totalorder %s430_s19, %s583_s7 }
 0x1e2   :  { %p436_p7 = pnand %p434_p6, %p431_p5 }
 0x1e4   :  { %439 = shalt.err (!%p436_p7)
}
 0x1e5   :  { %357 = dma.vmem_to_hbm [thread:$0]  %s355_s14, 16, %s583_s7, [#allocation4]  }
 0x1e6   :  { %440 = dma.done.wait [#allocation4], 16  }
 0x1e7   :  { %441 = vsyncadd [#allocation4], 4294967280 }
 0x1e8   :  { %361 = vsyncpa [#allocation4], 1 }

</bundles_post_ra>
